<compile_context>
chip_gen: v7x
topology: tpu7x:2x2x1
jax: 0.10.0
libtpu: 0.0.40
codegen_flags: <defaults>
</compile_context>

<pallas_src>
import jax
import jax.numpy as jnp
from jax import lax
from jax.experimental import pallas as pl
from jax.experimental.pallas import tpu as pltpu
import numpy as np


def _round_up(a, b):
    return ((a + b - 1) // b) * b


def _make_vq_kernel(total_rows):
    """Returns the Pallas kernel with the static row count baked in."""

    def kernel(x_ref, w_ref, wt_ref, wsq_ref, q_ref, sse_ref):
        i = pl.program_id(0)

        x = x_ref[...].astype(jnp.float32)          # (tn, D)
        w = w_ref[...].astype(jnp.float32)          # (K, D)  for onehot @ w
        wt = wt_ref[...].astype(jnp.float32)        # (D, K)  for the distance matmul
        w_sq = wsq_ref[...]                         # (1, K), precomputed in wrapper
        tn, D = x.shape
        K = w.shape[0]

        # Distance (up to the argmin-invariant per-row |x|^2 constant):
        #   dist ~ |e|^2 - 2 x.e      (tn, K)
        # The -2 is folded into the small (tn, D) operand; the codebook side is the
        # pre-transposed (D, K) copy so the MXU gets its natural orientation.
        xw_m2 = jnp.dot(x * (-2.0), wt, preferred_element_type=jnp.float32)  # (tn, K)
        dist = w_sq + xw_m2

        # Fused nearest-code selection: min + first-occurrence tie-break (matches
        # torch.argmin / jnp.argmin), producing the one-hot directly.
        min_d = jnp.min(dist, axis=-1, keepdims=True)                   # (tn, 1)
        iota = lax.broadcasted_iota(jnp.int32, (tn, K), 1)              # (tn, K)
        cand = jnp.where(dist <= min_d, iota, K)                        # K = sentinel
        first = jnp.min(cand, axis=-1, keepdims=True)                   # (tn, 1)
        onehot = (iota == first).astype(jnp.float32)                    # (tn, K)

        # One-hot @ embeddings (matches the PyTorch scatter_ + matmul path).
        quant = jnp.dot(onehot, w, preferred_element_type=jnp.float32)  # (tn, D)
        q_ref[...] = quant.astype(q_ref.dtype)

        # Per-tile partial SSE, reduced over sublanes only; lane collapse + total sum
        # finish in the wrapper so the grid axis stays fully parallel.  Rows beyond N
        # (padded tail tile) are masked out.
        row = lax.broadcasted_iota(jnp.int32, (tn, 1), 0) + i * tn
        valid = row < total_rows
        diff = jnp.where(valid, quant - x, 0.0)
        sse_ref[...] = jnp.sum(diff * diff, axis=0, keepdims=True).reshape(1, 1, D)

    return kernel


def vector_quantizer_forward(x, embeddings, commitment_cost, *, tile_n=4096):
    """x: (B, H, W, D) channels-last; embeddings: (K, D). Returns (quantized, loss)."""
    B, H, W, D = x.shape
    K, D2 = embeddings.shape
    assert D == D2, "last dim of x must equal embedding_dim"

    flat_x = x.reshape(-1, D)                       # (N, D)
    N = flat_x.shape[0]

    # Tile: as large as requested (multiple of 8), clamped so the grid keeps >= 2
    # steps whenever N allows (shards across both v7x TensorCores).
    tile_req = max(8, _round_up(tile_n, 8))
    tile_cap = max(8, _round_up((N + 1) // 2, 8))
    tile = min(tile_req, tile_cap)
    grid = (N + tile - 1) // tile

    # Hoisted codebook-side precompute: |e|^2 per code (1, K) and transposed codebook
    # (D, K) so the distance matmul never relayouts the stationary operand in-kernel.
    emb_f32 = embeddings.astype(jnp.float32)
    w_sq = jnp.sum(emb_f32 * emb_f32, axis=1).reshape(1, K)
    w_t = emb_f32.T                                                    # (D, K)

    kernel = _make_vq_kernel(N)

    quant_flat, sse_parts = pl.pallas_call(
        kernel,
        out_shape=(
            jax.ShapeDtypeStruct((N, D), x.dtype),
            jax.ShapeDtypeStruct((grid, 1, D), jnp.float32),
        ),
        grid_spec=pltpu.PrefetchScalarGridSpec(
            num_scalar_prefetch=0,
            grid=(grid,),
            in_specs=[
                pl.BlockSpec((tile, D), lambda i: (i, 0)),              # x tile
                pl.BlockSpec((K, D), lambda i: (0, 0)),                 # codebook (K, D)
                pl.BlockSpec((D, K), lambda i: (0, 0)),                 # codebook^T (D, K)
                pl.BlockSpec((1, K), lambda i: (0, 0)),                 # precomputed |e|^2
            ],
            out_specs=[
                pl.BlockSpec((tile, D), lambda i: (i, 0)),              # quantized tile
                pl.BlockSpec((1, 1, D), lambda i: (i, 0, 0)),           # per-tile SSE row
            ],
        ),
        compiler_params=pltpu.CompilerParams(
            dimension_semantics=("parallel",),                          # no serial reduction
            vmem_limit_bytes=48 * 1024 * 1024,                          # fits v5e/v6e/v7x
        ),
    )(flat_x, embeddings, w_t, w_sq)

    mse = jnp.sum(sse_parts) / float(N * D)
    # loss = q_latent_loss + commitment_cost * e_latent_loss (same forward value)
    loss = (1.0 + float(commitment_cost)) * mse
    quantized = quant_flat.reshape(B, H, W, D)
    return quantized, loss


def _reference_forward(x, embeddings, commitment_cost):
    """Pure-JAX reference mirroring the PyTorch forward (forward values only)."""
    D = x.shape[-1]
    flat_x = x.reshape(-1, D)
    dist = (jnp.sum(flat_x ** 2, axis=1, keepdims=True)
            + jnp.sum(embeddings ** 2, axis=1)
            - 2.0 * flat_x @ embeddings.T)
    idx = jnp.argmin(dist, axis=1)
    quant = embeddings[idx].reshape(x.shape)
    mse = jnp.mean((quant - x) ** 2)
    loss = (1.0 + commitment_cost) * mse
    return quant, loss


def _check(x, embeddings, commitment_cost, **kw):
    quantized, loss = vector_quantizer_forward(x, embeddings, commitment_cost, **kw)
    quantized = jax.block_until_ready(quantized)
    loss = jax.block_until_ready(loss)
    q_ref, l_ref = _reference_forward(x, embeddings, commitment_cost)
    np.testing.assert_allclose(np.asarray(quantized), np.asarray(q_ref),
                               rtol=1e-5, atol=1e-5)
    np.testing.assert_allclose(np.asarray(loss), np.asarray(l_ref),
                               rtol=1e-5, atol=1e-6)


if __name__ == "__main__":
    key = jax.random.PRNGKey(0)
    k_x, k_w, k_x2 = jax.random.split(key, 3)

    num_embeddings = 128
    embedding_dim = 32
    commitment_cost = 0.25

    # Deterministic init matching nn.Embedding(...).uniform_(-1/K, 1/K).
    embeddings = jax.random.uniform(
        k_w, (num_embeddings, embedding_dim), dtype=jnp.float32,
        minval=-1.0 / num_embeddings, maxval=1.0 / num_embeddings)

    # Small input consistent with the module: (B, H, W, D), D == embedding_dim.
    B, H, W = 2, 8, 8
    x = jax.random.normal(k_x, (B, H, W, embedding_dim), dtype=jnp.float32)
    _check(x, embeddings, commitment_cost)

    # Ragged case: N = 105 rows, forces multiple tiles + a masked partial tail tile.
    x2 = jax.random.normal(k_x2, (1, 5, 21, embedding_dim), dtype=jnp.float32)
    _check(x2, embeddings, commitment_cost, tile_n=64)

    print("KERNEL_OK")
</pallas_src>

<mosaic_0001>
module attributes {stable_mosaic.version = 11 : i64} {
  func.func @kernel(%arg0: i32, %arg1: memref<64x32xf32, #tpu.memory_space<vmem>>, %arg2: memref<128x32xf32, #tpu.memory_space<vmem>>, %arg3: memref<32x128xf32, #tpu.memory_space<vmem>>, %arg4: memref<1x128xf32, #tpu.memory_space<vmem>>, %arg5: memref<64x32xf32, #tpu.memory_space<vmem>>, %arg6: memref<1x1x32xf32, #tpu.memory_space<vmem>>) attributes {dimension_semantics = [#tpu.dimension_semantics<parallel>], iteration_bounds = array<i64: 2>, scalar_prefetch = 0 : i64, scratch_operands = 0 : i64, tpu.core_type = #tpu.core_type<tc>, window_params = [{transform_indices = @transform_0, window_bounds = array<i64: 64, 32>}, {pipeline_mode = #tpu.pipeline_mode<synchronous>, transform_indices = @transform_1, window_bounds = array<i64: 128, 32>}, {pipeline_mode = #tpu.pipeline_mode<synchronous>, transform_indices = @transform_2, window_bounds = array<i64: 32, 128>}, {pipeline_mode = #tpu.pipeline_mode<synchronous>, transform_indices = @transform_3, window_bounds = array<i64: 1, 128>}, {transform_indices = @transform_4, window_bounds = array<i64: 64, 32>}, {transform_indices = @transform_5, window_bounds = array<i64: 1, 1, 32>}]} {
    %c0 = arith.constant 0 : index
    %c0_0 = arith.constant 0 : index
    %0 = vector.load %arg1[%c0, %c0_0] : memref<64x32xf32, #tpu.memory_space<vmem>>, vector<64x32xf32>
    %c0_1 = arith.constant 0 : index
    %c0_2 = arith.constant 0 : index
    %1 = vector.load %arg2[%c0_1, %c0_2] : memref<128x32xf32, #tpu.memory_space<vmem>>, vector<128x32xf32>
    %c0_3 = arith.constant 0 : index
    %c0_4 = arith.constant 0 : index
    %2 = vector.load %arg3[%c0_3, %c0_4] : memref<32x128xf32, #tpu.memory_space<vmem>>, vector<32x128xf32>
    %c0_5 = arith.constant 0 : index
    %c0_6 = arith.constant 0 : index
    %3 = vector.load %arg4[%c0_5, %c0_6] : memref<1x128xf32, #tpu.memory_space<vmem>>, vector<1x128xf32>
    %cst = arith.constant -2.000000e+00 : f32
    %4 = vector.broadcast %cst : f32 to vector<64x32xf32>
    %5 = arith.mulf %0, %4 : vector<64x32xf32>
    %cst_7 = arith.constant dense<0.000000e+00> : vector<64x128xf32>
    %6 = tpu.matmul %5, %2, %cst_7 {dimension_numbers = #tpu.dot_dimension_numbers<[1], [0], [0], [1], [0, 0, 1, 1], [], []>} : vector<64x32xf32>, vector<32x128xf32>, vector<64x128xf32> -> vector<64x128xf32>
    %7 = vector.broadcast %3 : vector<1x128xf32> to vector<64x128xf32>
    %8 = arith.addf %7, %6 : vector<64x128xf32>
    %cst_8 = arith.constant dense<0x7F800000> : vector<64xf32>
    %9 = vector.multi_reduction <minimumf>, %8, %cst_8 [1] : vector<64x128xf32> to vector<64xf32>
    %10 = vector.shape_cast %9 : vector<64xf32> to vector<64x1xf32>
    %11 = tpu.iota {dimensions = array<i32: 1>} : vector<64x128xi32>
    %12 = vector.broadcast %10 : vector<64x1xf32> to vector<64x128xf32>
    %13 = arith.cmpf ole, %8, %12 : vector<64x128xf32>
    %c128_i32 = arith.constant 128 : i32
    %14 = vector.broadcast %c128_i32 : i32 to vector<64x128xi32>
    %15 = arith.select %13, %11, %14 : vector<64x128xi1>, vector<64x128xi32>
    %cst_9 = arith.constant dense<2147483647> : vector<64xi32>
    %16 = vector.multi_reduction <minsi>, %15, %cst_9 [1] : vector<64x128xi32> to vector<64xi32>
    %17 = vector.shape_cast %16 : vector<64xi32> to vector<64x1xi32>
    %18 = vector.broadcast %17 : vector<64x1xi32> to vector<64x128xi32>
    %19 = arith.cmpi eq, %11, %18 : vector<64x128xi32>
    %20 = arith.extui %19 : vector<64x128xi1> to vector<64x128xi32>
    %21 = arith.sitofp %20 : vector<64x128xi32> to vector<64x128xf32>
    %cst_10 = arith.constant dense<0.000000e+00> : vector<64x32xf32>
    %22 = tpu.matmul %21, %1, %cst_10 {dimension_numbers = #tpu.dot_dimension_numbers<[1], [0], [0], [1], [0, 0, 1, 1], [], []>} : vector<64x128xf32>, vector<128x32xf32>, vector<64x32xf32> -> vector<64x32xf32>
    %c0_11 = arith.constant 0 : index
    %c0_12 = arith.constant 0 : index
    %23 = vector.load %arg5[%c0_11, %c0_12] : memref<64x32xf32, #tpu.memory_space<vmem>>, vector<64x32xf32>
    tpu.vector_store %arg5[%c0_11, %c0_12], %22 {strides = array<i32>} : memref<64x32xf32, #tpu.memory_space<vmem>>, vector<64x32xf32>,
    %24 = tpu.iota {dimensions = array<i32: 0>} : vector<64x1xi32>
    %c64_i32 = arith.constant 64 : i32
    %25 = arith.muli %arg0, %c64_i32 : i32
    %26 = vector.broadcast %25 : i32 to vector<64x1xi32>
    %27 = arith.addi %24, %26 : vector<64x1xi32>
    %c128_i32_13 = arith.constant 128 : i32
    %28 = vector.broadcast %c128_i32_13 : i32 to vector<64x1xi32>
    %29 = arith.cmpi slt, %27, %28 : vector<64x1xi32>
    %30 = arith.subf %22, %0 : vector<64x32xf32>
    %cst_14 = arith.constant 0.000000e+00 : f32
    %31 = vector.shape_cast %29 : vector<64x1xi1> to vector<64x1xi1>
    %32 = vector.broadcast %31 : vector<64x1xi1> to vector<64x32xi1>
    %33 = vector.broadcast %cst_14 : f32 to vector<64x32xf32>
    %34 = arith.select %32, %30, %33 : vector<64x32xi1>, vector<64x32xf32>
    %35 = arith.mulf %34, %34 : vector<64x32xf32>
    %cst_15 = arith.constant dense<0.000000e+00> : vector<32xf32>
    %36 = vector.multi_reduction <add>, %35, %cst_15 [0] : vector<64x32xf32> to vector<32xf32>
    %37 = vector.shape_cast %36 : vector<32xf32> to vector<1x32xf32>
    %38 = vector.shape_cast %37 : vector<1x32xf32> to vector<1x1x32xf32>
    %c0_16 = arith.constant 0 : index
    %c0_17 = arith.constant 0 : index
    %c0_18 = arith.constant 0 : index
    %39 = vector.load %arg6[%c0_16, %c0_17, %c0_18] : memref<1x1x32xf32, #tpu.memory_space<vmem>>, vector<1x1x32xf32>
    tpu.vector_store %arg6[%c0_16, %c0_17, %c0_18], %38 {strides = array<i32>} : memref<1x1x32xf32, #tpu.memory_space<vmem>>, vector<1x1x32xf32>,
    return
  }
  func.func @transform_0(%arg0: i32) -> (i32, i32) {
    %c0_i32 = arith.constant 0 : i32
    %c0_i32_0 = arith.constant 0 : i32
    return %arg0, %c0_i32 : i32, i32
  }
  func.func @transform_1(%arg0: i32) -> (i32, i32) {
    %c0_i32 = arith.constant 0 : i32
    %c0_i32_0 = arith.constant 0 : i32
    %c0_i32_1 = arith.constant 0 : i32
    return %c0_i32, %c0_i32_0 : i32, i32
  }
  func.func @transform_2(%arg0: i32) -> (i32, i32) {
    %c0_i32 = arith.constant 0 : i32
    %c0_i32_0 = arith.constant 0 : i32
    %c0_i32_1 = arith.constant 0 : i32
    return %c0_i32, %c0_i32_0 : i32, i32
  }
  func.func @transform_3(%arg0: i32) -> (i32, i32) {
    %c0_i32 = arith.constant 0 : i32
    %c0_i32_0 = arith.constant 0 : i32
    %c0_i32_1 = arith.constant 0 : i32
    return %c0_i32, %c0_i32_0 : i32, i32
  }
  func.func @transform_4(%arg0: i32) -> (i32, i32) {
    %c0_i32 = arith.constant 0 : i32
    %c0_i32_0 = arith.constant 0 : i32
    return %arg0, %c0_i32 : i32, i32
  }
  func.func @transform_5(%arg0: i32) -> (i32, i32, i32) {
    %c0_i32 = arith.constant 0 : i32
    %c0_i32_0 = arith.constant 0 : i32
    %c0_i32_1 = arith.constant 0 : i32
    return %arg0, %c0_i32, %c0_i32_0 : i32, i32, i32
  }
}

</mosaic_0001>

<bundles_post_ra>
// kernel: tpu_custom_call.1
= control target key start
LH: loop header
LB: loop body
LE: loop exit
PB: predicated region body
PF: predicated region fallthrough
CT: control target
= control target key end

     0   :  { %11 = vsyncpa [#allocation3], 0  ;;  %s1563_s0 = inlined_call_operand.vmem [shape: f32[128,32], index: 0, kind: input, shape index: {}]   ;;  %s1564_s1 = inlined_call_operand.vmem [shape: f32[128,32], index: 1, kind: input, shape index: {}]   ;;  %s1565_s2 = inlined_call_operand.vmem [shape: f32[32,128], index: 2, kind: input, shape index: {}]   ;;  %s1566_s3 = inlined_call_operand.vmem [shape: f32[1,128], index: 3, kind: input, shape index: {}]   ;;  %s1567_s4 = inlined_call_operand.vmem [shape: f32[128,32], index: 4, kind: output, shape index: {0}]   ;;  %s1568_s5 = inlined_call_operand.hbm [shape: f32[2,1,32], index: 5, kind: output, shape index: {1}]  }
   0x1   :  { %13 = vsyncpa [#allocation3 + $0x1], 0  ;;  %s1223_s18 = smov 0   ;;  %s1225_s19 = smov 0  }
   0x2   :  { %s1227_s20 = smov 0   ;;  %s1229_s21 = smov 0  }
   0x3 LB: > { %s1244_s22 = sadd.s32 4294967295, %s1189_s21   ;;  %s894_s23 = sadd.s32 4294967294, %s1189_s21   ;;  %s1189_s21 = sphi %s1229_s21, %s1574_s21   ;;  %s1185_s20 = sphi %s1227_s20, %s1573_s20   ;;  %s1181_s19 = sphi %s1225_s19, %s1572_s19   ;;  %s1177_s18 = sphi %s1223_s18, %s1571_s18  }
   0x4   : > { %s1248_s24 = sadd.s32 1, %s1189_s21   ;;  %s141_s25 = sadd.s32 1, %s1185_s20 }
   0x5   : > { %s138_s26 = ssub.s32 %s1189_s21, %s1248_s24  ;;  %p151_p0 = scmp.ne.s32.totalorder %s1185_s20, %s1181_s19 }
   0x6   : > { %p139_p1 = scmp.eq.s32.totalorder %s138_s26, 0  ;;  %p152_p2 = scmp.eq.s32.totalorder %s1244_s22, 1 }
   0x7   : > { %p157_p3 = scmp.ne.s32.totalorder %s1181_s19, %s1177_s18  ;;  %p158_p4 = scmp.eq.s32.totalorder %s894_s23, 1 }
   0x8   : > { %s1259_s27 = scalar_select %p139_p1, %s1185_s20, %s141_s25  }
   0x9   : > { %p1261_p5 = por %p152_p2, %p151_p0  ;;  %p1265_p6 = por %p158_p4, %p157_p3 }
   0xa   : > { %p897_p7 = scmp.ge.s32.totalorder %s1189_s21, 1  ;;  %p194_p8 = scmp.lt.s32.totalorder %s1189_s21, 3 }
   0xc   : > { %p195_p9 = pnand %p897_p7, %p194_p8 }
   0xd   : > { %v262_v0 = vld [vmem:[%s1565_s2] sm:$0xff] (!%p195_p9)  ;;  %v263_v1 = vld [vmem:[%s1565_s2 + $0x8] sm:$0xff] (!%p195_p9)  ;;  %v264_v2 = vld [vmem:[%s1565_s2 + $0x10] sm:$0xff] (!%p195_p9)  ;;  %s898_s11 = sshll.u32 (!%p195_p9), %s1244_s22, 3  ;;  %vm275_vm0 = vcmask (!%p195_p9), 261120   ;;  %v435_v39 = vlaneseq (!%p195_p9)  ;;  %s927_s8 = sshll.u32 (!%p195_p9), %s1244_s22, 6 }
   0xe   : > { %198 = sbr.rel (%p195_p9) target bundleno = 947 (0x3b3), region = 36  ;;  %v1031_v3 = vpack.c.bf16 (!%p195_p9), %v263_v1, %v262_v0  ;;  %v265_v4 = vld [vmem:[%s1565_s2 + $0x18] sm:$0xff] (!%p195_p9)  ;;  %p227_p10 = scmp.lt.s32.totalorder (!%p195_p9), %s898_s11, 15  ;;  %v910_v22 = vld [vmem:[%s1566_s3] ss:$0 sm:$0xff] (!%p195_p9) }
   0xf   : > { %v1035_v5 = vpack.c.bf16 (!%p195_p9), %v265_v4, %v264_v2  ;;  %v1328_v40 = vand.u32 (!%p195_p9), 127, %v435_v39 }
  0x10   : > { %1032 = vmatprep.subr.bf16.mxu0 (!%p195_p9), %v1031_v3 }
  0x11   : > { %1034 = vmatpush3.bf16.msra.mxu0 (!%p195_p9), %v1031_v3 }
  0x12   : > { %1036 = vmatprep.subr.bf16.mxu0 (!%p195_p9), %v1035_v5 }
  0x15   : > { %s1576_s11 = smov (!%p227_p10, %s898_s11), 15  ;;  %1038 = vmatpush3.bf16.msra.mxu0 %v1035_v5 }
  0x16   : > { %s899_s14 = sshll.u32 %s1576_s11, 3  ;;  %s224_s11 = sand.u32 1, %s1181_s19  }
  0x17   : > { %s230_s17 = scalar_lea.vmem %s1563_s0, %s899_s14  ;;  %s1481_s12 = scalar_lea.vmem %s1567_s4, %s899_s14 }
  0x18   : > { %v1292_v6 = vld [vmem:[%s230_s17] sm:$0xff]  ;;  %v1294_v7 = vld [vmem:[%s230_s17 + $0x8] sm:$0xff]  ;;  %v1296_v8 = vld [vmem:[%s230_s17 + $0x10] sm:$0xff]  ;;  %s928_s14 = sshll.u32 %s1244_s22, 4  ;;  %s225_s13 = scalar_lea.vmem [#allocation2], %s224_s11 }
  0x19   : > { %v267_v9 = vmul.f32 -2.0, %v1292_v6  ;;  %v268_v10 = vmul.f32 -2.0, %v1294_v7  ;;  %v269_v11 = vmul.f32 -2.0, %v1296_v8  ;;  %v1301_v12 = vld [vmem:[%s230_s17 + $0x18] sm:$0xff]  ;;  %v1303_v13 = vld [vmem:[%s230_s17 + $0x20] sm:$0xff]  ;;  %v1310_v16 = vld [vmem:[%s230_s17 + $0x28] sm:$0xff]  ;;  %s1521_s23 = scalar_lea.hbm %s1568_s5, %s928_s14 }
  0x1a   : > { %v270_v14 = vmul.f32 -2.0, %v1301_v12  ;;  %v271_v15 = vmul.f32 -2.0, %v1303_v13  ;;  %v1312_v17 = vld [vmem:[%s230_s17 + $0x30] sm:$0xff]  ;;  %v272_v18 = vmul.f32 -2.0, %v1310_v16  ;;  %v1318_v20 = vld [vmem:[%s230_s17 + $0x38] sm:$0xff]  ;;  %s814_s15 = sshll.u32 %s225_s13, 4  ;;  %s1523_s15 = int_to_ptr.vmem [resolvable:$true] %s814_s15 }
  0x1b   : > { %975 = vmatprep.mubr.msk.f32.mxu0 %vm275_vm0, %v267_v9  ;;  %v273_v19 = vmul.f32 -2.0, %v1312_v17  ;;  %v274_v21 = vmul.f32 -2.0, %v1318_v20  ;;  %s798_s25 = scalar_lea.sflag [#allocation3], %s224_s11  ;;  %s1127_s26 = scalar_lea.vmem %s1523_s15, 16 }
  0x1c   : > { %976 = vmatmul.mubr.msk.f32.vlgmr.msra.gmra.mrb[0].mxu0 %vm275_vm0, %v268_v10  ;;  %p1128_p11 = scmp.ne.s32.totalorder %s1523_s15, %s1127_s26  ;;  %s1192_s22 = smov [#allocation2]  }
  0x1d   : > { %978 = vmatprep.mubr.msk.f32.mxu0 %vm275_vm0, %v269_v11  ;;  %s1131_s30 = sshll.u32 %s1192_s22, 4  ;;  %s1132_s30 = int_to_ptr.vmem [resolvable:$false] %s1131_s30 }
  0x1e   : > { %p1129_p12 = pnand %p1128_p11, %p1261_p5  ;;  %s1133_s6 = scalar_lea.vmem %s1132_s30, 32 }
  0x1f   : > { %p1134_p0 = scmp.lt.s32.totalorder %s1523_s15, %s1132_s30  ;;  %p1135_p1 = scmp.lt.s32.totalorder %s1133_s6, %s1127_s26 }
  0x20   : > { %979 = vmatmul.mubr.msk.f32.gmra.mrb[2].mxu0 %vm275_vm0, %v270_v14  ;;  %v246_v14 = vld [vmem:[%s1564_s1] sm:$0xff]  ;;  %p1130_p13 = pneg %p1129_p12 }
  0x21   : > { %981 = vmatprep.mubr.msk.f32.mxu0 %vm275_vm0, %v271_v15  ;;  %v247_v15 = vld [vmem:[%s1564_s1 + $0x8] sm:$0xff]  ;;  %p1136_p2 = por %p1135_p1, %p1134_p0 }
  0x23   : > { %p1137_p3 = pnand %p1136_p2, %p1130_p13 }
  0x24   : > { %982 = vmatmul.mubr.msk.f32.gmra.mrb[4].mxu0 %vm275_vm0, %v272_v18  ;;  %v248_v18 = vld [vmem:[%s1564_s1 + $0x10] sm:$0xff] }
  0x25   : > { %984 = vmatprep.mubr.msk.f32.mxu0 %vm275_vm0, %v273_v19  ;;  %v1039_v19 = vpack.c.bf16 %v247_v15, %v246_v14  ;;  %v260_v14 = vld [vmem:[%s1564_s1 + $0x70] sm:$0xff]  ;;  %v261_v15 = vld [vmem:[%s1564_s1 + $0x78] sm:$0xff] }
  0x27   : > { %1040 = vmatprep.subr.bf16.mxu0 %v1039_v19  ;;  %1071 = vmatprep.subr.bf16.mxu1 %v1039_v19 }
  0x28   : > { %985 = vmatmul.mubr.msk.f32.gmra.mrb[6].mxu0 %vm275_vm0, %v274_v21  ;;  %v249_v21 = vld [vmem:[%s1564_s1 + $0x18] sm:$0xff]  ;;  %1079 = vmatpush3.bf16.msra.mxu1 %v1039_v19 }
  0x29   : > { %1042 = vmatpush3.bf16.msra.mxu0 %v1039_v19 }
  0xef   : > { %v977_v23 = vpop.f32.mrb[0].mxu0 }
  0xf0   : > { %v366_v24 = vpop.f32.mrb[1].mxu0  ;;  %v412_v28 = vadd.f32 %v977_v23, %v910_v22  ;;  %v250_v23 = vld [vmem:[%s1564_s1 + $0x20] sm:$0xff] }
  0xf1   : > { %v411_v25 = vadd.f32 %v910_v22, %v366_v24  ;;  %v251_v24 = vld [vmem:[%s1564_s1 + $0x28] sm:$0xff] }
  0xf3   : > { %419 = vmin.xlane.f32.xlu0 %v411_v25  ;;  %v980_v26 = vpop.f32.mrb[2].mxu0 }
  0xf4   : > { %v376_v27 = vpop.f32.mrb[3].mxu0  ;;  %v414_v32 = vadd.f32 %v980_v26, %v910_v22  ;;  %v252_v26 = vld [vmem:[%s1564_s1 + $0x30] sm:$0xff] }
  0xf5   : > { %v413_v29 = vadd.f32 %v910_v22, %v376_v27  ;;  %v253_v27 = vld [vmem:[%s1564_s1 + $0x38] sm:$0xff] }
  0xf7   : > { %421 = vmin.xlane.f32.xlu0 %v412_v28  ;;  %423 = vmin.xlane.f32.xlu1 %v413_v29  ;;  %v983_v30 = vpop.f32.mrb[4].mxu0 }
  0xf8   : > { %v386_v31 = vpop.f32.mrb[5].mxu0  ;;  %v416_v36 = vadd.f32 %v983_v30, %v910_v22  ;;  %v255_v30 = vld [vmem:[%s1564_s1 + $0x48] sm:$0xff] }
  0xf9   : > { %v415_v33 = vadd.f32 %v910_v22, %v386_v31 }
  0xfb   : > { %425 = vmin.xlane.f32.xlu1 %v414_v32  ;;  %427 = vmin.xlane.f32.xlu0 %v415_v33  ;;  %v986_v34 = vpop.f32.mrb[6].mxu0 }
  0xfc   : > { %v396_v35 = vpop.f32.mrb[7].mxu0  ;;  %v418_v38 = vadd.f32 %v986_v34, %v910_v22 }
  0xfd   : > { %v417_v37 = vadd.f32 %v910_v22, %v396_v35  ;;  %v1043_v22 = vpack.c.bf16 %v249_v21, %v248_v18  ;;  %v1067_v18 = vpack.c.bf16 %v261_v15, %v260_v14 }
  0xff   : > { %429 = vmin.xlane.f32.xlu1 %v416_v36  ;;  %431 = vmin.xlane.f32.xlu0 %v417_v37 }
 0x100   : > { %1044 = vmatprep.subr.bf16.mxu0 %v1043_v22  ;;  %1072 = vmatprep.subr.bf16.mxu1 %v1043_v22 }
 0x101   : > { %1046 = vmatpush3.bf16.msra.mxu0 %v1043_v22  ;;  %1080 = vmatpush3.bf16.msra.mxu1 %v1043_v22 }
 0x103   : > { %433 = vmin.xlane.f32.xlu1 %v418_v38 }
 0x180   : > { %v420_v41 = vpop.xlane.xlu0 %419 }
 0x181   : > { %vm437_vm1 = vcmp.le.f32.partialorder %v411_v25, %v420_v41  ;;  %v1047_v25 = vpack.c.bf16 %v251_v24, %v250_v23 }
 0x182   : > { %v1331_v42 = vsel %vm437_vm1, %v1328_v40, 128 }
 0x183   : > { %v454_v43 = vshra.s32 %v1331_v42, 16  ;;  %1048 = vmatprep.subr.bf16.mxu0 %v1047_v25  ;;  %1073 = vmatprep.subr.bf16.mxu1 %v1047_v25  ;;  %v453_v35 = vand.u32 65535, %v1331_v42 }
 0x184   : > { %v422_v44 = vpop.xlane.xlu0 %421  ;;  %v424_v45 = vpop.xlane.xlu1 %423  ;;  %1050 = vmatpush3.bf16.msra.mxu0 %v1047_v25  ;;  %1081 = vmatpush3.bf16.msra.mxu1 %v1047_v25 }
 0x185   : > { %vm438_vm2 = vcmp.le.f32.partialorder %v412_v28, %v422_v44  ;;  %vm439_vm3 = vcmp.le.f32.partialorder %v413_v29, %v424_v45  ;;  %v1334_v46 = vcvt.s32.f32 %v454_v43  ;;  %v1051_v28 = vpack.c.bf16 %v253_v27, %v252_v26  ;;  %v254_v29 = vld [vmem:[%s1564_s1 + $0x40] sm:$0xff] }
 0x186   : > { %v1337_v47 = vsel %vm438_vm2, %v1328_v40, 128  ;;  %v1340_v48 = vsel %vm439_vm3, %v1328_v40, 128  ;;  %v1055_v31 = vpack.c.bf16 %v255_v30, %v254_v29  ;;  %v455_v41 = vcvt.s32.f32 %v453_v35 }
 0x187   : > { %457 = vmin.xlane.f32.xlu0 %v1334_v46  ;;  %v468_v49 = vshra.s32 %v1337_v47, 16  ;;  %v482_v50 = vshra.s32 %v1340_v48, 16  ;;  %1052 = vmatprep.subr.bf16.mxu0 %v1051_v28 }
 0x188   : > { %v426_v51 = vpop.xlane.xlu1 %425  ;;  %v428_v52 = vpop.xlane.xlu0 %427  ;;  %1074 = vmatprep.subr.bf16.mxu1 %v1051_v28  ;;  %1054 = vmatpush3.bf16.msra.mxu0 %v1051_v28 }
 0x189   : > { %vm440_vm4 = vcmp.le.f32.partialorder %v414_v32, %v426_v51  ;;  %vm441_vm5 = vcmp.le.f32.partialorder %v415_v33, %v428_v52  ;;  %v1345_v53 = vcvt.s32.f32 %v468_v49  ;;  %v1347_v54 = vcvt.s32.f32 %v482_v50  ;;  %v256_v32 = vld [vmem:[%s1564_s1 + $0x50] sm:$0xff]  ;;  %v257_v33 = vld [vmem:[%s1564_s1 + $0x58] sm:$0xff]  ;;  %1082 = vmatpush3.bf16.msra.mxu1 %v1051_v28  ;;  %1056 = vmatprep.subr.bf16.mxu0 %v1055_v31 }
 0x18a   : > { %v1350_v55 = vsel %vm440_vm4, %v1328_v40, 128  ;;  %v1353_v56 = vsel %vm441_vm5, %v1328_v40, 128  ;;  %1075 = vmatprep.subr.bf16.mxu1 %v1055_v31  ;;  %v1059_v34 = vpack.c.bf16 %v257_v33, %v256_v32 }
 0x18b   : > { %471 = vmin.xlane.f32.xlu1 %v1345_v53  ;;  %485 = vmin.xlane.f32.xlu0 %v1347_v54  ;;  %v496_v57 = vshra.s32 %v1350_v55, 16  ;;  %v510_v58 = vshra.s32 %v1353_v56, 16  ;;  %v495_v44 = vand.u32 65535, %v1350_v55  ;;  %v509_v45 = vand.u32 65535, %v1353_v56 }
 0x18c   : > { %v430_v59 = vpop.xlane.xlu1 %429  ;;  %v432_v60 = vpop.xlane.xlu0 %431  ;;  %1058 = vmatpush3.bf16.msra.mxu0 %v1055_v31 }
 0x18d   : > { %vm442_vm6 = vcmp.le.f32.partialorder %v416_v36, %v430_v59  ;;  %vm443_vm7 = vcmp.le.f32.partialorder %v417_v37, %v432_v60  ;;  %v1359_v61 = vcvt.s32.f32 %v496_v57  ;;  %v1361_v62 = vcvt.s32.f32 %v510_v58  ;;  %1083 = vmatpush3.bf16.msra.mxu1 %v1055_v31  ;;  %1060 = vmatprep.subr.bf16.mxu0 %v1059_v34 }
 0x18e   : > { %v1364_v63 = vsel %vm442_vm6, %v1328_v40, 128  ;;  %v1367_v0 = vsel %vm443_vm7, %v1328_v40, 128  ;;  %1076 = vmatprep.subr.bf16.mxu1 %v1059_v34  ;;  %v467_v36 = vand.u32 65535, %v1337_v47  ;;  %v481_v37 = vand.u32 65535, %v1340_v48 }
 0x18f   : > { %499 = vmin.xlane.f32.xlu1 %v1359_v61  ;;  %513 = vmin.xlane.f32.xlu0 %v1361_v62  ;;  %v524_v1 = vshra.s32 %v1364_v63, 16  ;;  %v538_v2 = vshra.s32 %v1367_v0, 16  ;;  %v537_v48 = vand.u32 65535, %v1367_v0  ;;  %v497_v57 = vcvt.s32.f32 %v495_v44 }
 0x190   : > { %v434_v3 = vpop.xlane.xlu1 %433  ;;  %1062 = vmatpush3.bf16.msra.mxu0 %v1059_v34  ;;  %v469_v51 = vcvt.s32.f32 %v467_v36  ;;  %v483_v52 = vcvt.s32.f32 %v481_v37  ;;  %v511_v58 = vcvt.s32.f32 %v509_v45 }
 0x191   : > { %vm444_vm8 = vcmp.le.f32.partialorder %v418_v38, %v434_v3  ;;  %v1373_v4 = vcvt.s32.f32 %v524_v1  ;;  %v1375_v5 = vcvt.s32.f32 %v538_v2  ;;  %1084 = vmatpush3.bf16.msra.mxu1 %v1059_v34  ;;  %v539_v0 = vcvt.s32.f32 %v537_v48 }
 0x192   : > { %v1378_v9 = vsel %vm444_vm8, %v1328_v40, 128  ;;  %v1191_v34 = vmov 1.0  }
 0x193   : > { %527 = vmin.xlane.f32.xlu1 %v1373_v4  ;;  %541 = vmin.xlane.f32.xlu0 %v1375_v5  ;;  %v552_v10 = vshra.s32 %v1378_v9, 16 }
 0x195   : > { %v1383_v11 = vcvt.s32.f32 %v552_v10  ;;  %v259_v10 = vld [vmem:[%s1564_s1 + $0x68] sm:$0xff] }
 0x197   : > { %555 = vmin.xlane.f32.xlu1 %v1383_v11 }
 0x214   : > { %v458_v38 = vpop.xlane.xlu0 %457 }
 0x215   : > { %vm459_vm9 = vcmp.eq.f32.partialorder %v1334_v46, %v458_v38  ;;  %v523_v46 = vand.u32 65535, %v1364_v63 }
 0x216   : > { %v460_v43 = vsel %vm459_vm9, %v455_v41, inf }
 0x217   : > { %461 = vmin.xlane.f32.xlu0 %v460_v43  ;;  %v525_v63 = vcvt.s32.f32 %v523_v46 }
 0x218   : > { %v472_v49 = vpop.xlane.xlu1 %471  ;;  %v1428_v50 = vpop.xlane.xlu0 %485 }
 0x219   : > { %vm473_vm10 = vcmp.eq.f32.partialorder %v1345_v53, %v472_v49  ;;  %vm487_vm11 = vcmp.eq.f32.partialorder %v1347_v54, %v1428_v50  ;;  %v551_v54 = vand.u32 65535, %v1378_v9  ;;  %v258_v9 = vld [vmem:[%s1564_s1 + $0x60] sm:$0xff]  ;;  %v478_v19 = vcvt.f32.s32 %v472_v49 }
 0x21a   : > { %v474_v42 = vsel %vm473_vm10, %v469_v51, inf  ;;  %v488_v47 = vsel %vm487_vm11, %v483_v52, inf  ;;  %v492_v23 = vcvt.f32.s32 %v1428_v50 }
 0x21b   : > { %475 = vmin.xlane.f32.xlu1 %v474_v42  ;;  %489 = vmin.xlane.f32.xlu0 %v488_v47  ;;  %v553_v3 = vcvt.s32.f32 %v551_v54  ;;  %v479_v26 = vshll.u32 %v478_v19, 16 }
 0x21c   : > { %v500_v55 = vpop.xlane.xlu1 %499  ;;  %v514_v56 = vpop.xlane.xlu0 %513  ;;  %v493_v31 = vshll.u32 %v492_v23, 16 }
 0x21d   : > { %vm501_vm12 = vcmp.eq.f32.partialorder %v1359_v61, %v500_v55  ;;  %vm515_vm13 = vcmp.eq.f32.partialorder %v1361_v62, %v514_v56  ;;  %v506_v27 = vcvt.f32.s32 %v500_v55  ;;  %v520_v28 = vcvt.f32.s32 %v514_v56 }
 0x21e   : > { %v502_v53 = vsel %vm501_vm12, %v497_v57, inf  ;;  %v516_v59 = vsel %vm515_vm13, %v511_v58, inf }
 0x21f   : > { %503 = vmin.xlane.f32.xlu1 %v502_v53  ;;  %517 = vmin.xlane.f32.xlu0 %v516_v59  ;;  %v507_v37 = vshll.u32 %v506_v27, 16 }
 0x220   : > { %v1438_v60 = vpop.xlane.xlu1 %527  ;;  %v1440_v1 = vpop.xlane.xlu0 %541 }
 0x221   : > { %vm529_vm14 = vcmp.eq.f32.partialorder %v1373_v4, %v1438_v60  ;;  %vm543_vm15 = vcmp.eq.f32.partialorder %v1375_v5, %v1440_v1  ;;  %v1063_v4 = vpack.c.bf16 %v259_v10, %v258_v9  ;;  %v534_v41 = vcvt.f32.s32 %v1438_v60 }
 0x222   : > { %v530_v61 = vsel %vm529_vm14, %v525_v63, inf  ;;  %v544_v62 = vsel %vm543_vm15, %v539_v0, inf  ;;  %v548_v43 = vcvt.f32.s32 %v1440_v1  ;;  %v703_v63 = vshrl.u32 %v435_v39, 7 }
 0x223   : > { %531 = vmin.xlane.f32.xlu1 %v530_v61  ;;  %545 = vmin.xlane.f32.xlu0 %v544_v62  ;;  %v535_v42 = vshll.u32 %v534_v41, 16  ;;  %v712_v61 = vstv %s927_s8 }
 0x224   : > { %v1446_v2 = vpop.xlane.xlu1 %555  ;;  %1064 = vmatprep.subr.bf16.mxu0 %v1063_v4  ;;  %1077 = vmatprep.subr.bf16.mxu1 %v1063_v4  ;;  %v549_v47 = vshll.u32 %v548_v43, 16  ;;  %v704_v0 = vadd.s32 8, %v703_v63  ;;  %v706_v62 = vadd.s32 24, %v703_v63  ;;  %v705_v9 = vadd.s32 16, %v703_v63 }
 0x225   : > { %vm557_vm1 = vcmp.eq.f32.partialorder %v1383_v11, %v1446_v2  ;;  %1066 = vmatpush3.bf16.msra.mxu0 %v1063_v4  ;;  %1085 = vmatpush3.bf16.msra.mxu1 %v1063_v4  ;;  %v464_v11 = vcvt.f32.s32 %v458_v38  ;;  %v521_v38 = vshll.u32 %v520_v28, 16  ;;  %v562_v46 = vcvt.f32.s32 %v1446_v2 }
 0x226   : > { %v558_v5 = vsel %vm557_vm1, %v553_v3, inf  ;;  %1068 = vmatprep.subr.bf16.mxu0 %v1067_v18  ;;  %1078 = vmatprep.subr.bf16.mxu1 %v1067_v18  ;;  %v714_v2 = vadd.s32 %v712_v61, %v704_v0  ;;  %v713_v3 = vadd.s32 %v712_v61, %v703_v63  ;;  %v716_v10 = vadd.s32 %v712_v61, %v706_v62 }
 0x227   : > { %559 = vmin.xlane.f32.xlu1 %v558_v5  ;;  %v465_v22 = vshll.u32 %v464_v11, 16  ;;  %v563_v54 = vshll.u32 %v562_v46, 16  ;;  %v715_v14 = vadd.s32 %v712_v61, %v705_v9  ;;  %v707_v15 = vadd.s32 32, %v703_v63 }
 0x228   : > { %vm722_vm10 = vcmp.lt.s32.totalorder %v714_v2, 128  ;;  %vm721_vm11 = vcmp.lt.s32.totalorder %v713_v3, 128  ;;  %vm724_vm12 = vcmp.lt.s32.totalorder %v716_v10, 128 }
 0x229   : > { %1070 = vmatpush3.bf16.msra.mxu0 %v1067_v18  ;;  %1086 = vmatpush3.bf16.msra.mxu1 %v1067_v18  ;;  %vm723_vm13 = vcmp.lt.s32.totalorder %v715_v14, 128  ;;  %v717_v28 = vadd.s32 %v712_v61, %v707_v15 }
 0x22b   : > { %vm725_vm15 = vcmp.lt.s32.totalorder %v717_v28, 128 }
 0x2a4   : > { %v462_v21 = vpop.xlane.xlu0 %461 }
 0x2a5   : > { %v463_v24 = vcvt.f32.s32 %v462_v21 }
 0x2a7   : > { %v466_v25 = vadd.s32 %v465_v22, %v463_v24  ;;  %v710_v24 = vadd.s32 56, %v703_v63 }
 0x2a8   : > { %v476_v29 = vpop.xlane.xlu1 %475  ;;  %v490_v30 = vpop.xlane.xlu0 %489 }
 0x2a9   : > { %v477_v32 = vcvt.f32.s32 %v476_v29  ;;  %v491_v33 = vcvt.f32.s32 %v490_v30  ;;  %vm565_vm2 = vcmp.eq.s32.totalorder %v1328_v40, %v466_v25  ;;  %v709_v25 = vadd.s32 48, %v703_v63 }
 0x2aa   : > { %1019 = vmatprep.mubr.msk.f32.mxu0 %vm565_vm2, %v1191_v34 }
 0x2ab   : > { %v480_v35 = vadd.s32 %v479_v26, %v477_v32  ;;  %v494_v36 = vadd.s32 %v493_v31, %v491_v33 }
 0x2ac   : > { %v504_v44 = vpop.xlane.xlu1 %503  ;;  %v518_v45 = vpop.xlane.xlu0 %517 }
 0x2ad   : > { %vm566_vm3 = vcmp.eq.s32.totalorder %v1328_v40, %v480_v35  ;;  %v505_v49 = vcvt.f32.s32 %v504_v44  ;;  %v519_v50 = vcvt.f32.s32 %v518_v45  ;;  %vm567_vm4 = vcmp.eq.s32.totalorder %v1328_v40, %v494_v36 }
 0x2ae   : > { %1020 = vmatmul.mubr.msk.f32.vlgmr.msra.gmra.mrb[8].mxu0 %vm566_vm3, %v1191_v34  ;;  %1022 = vmatprep.mubr.msk.f32.mxu1 %vm567_vm4, %v1191_v34  ;;  %v719_v35 = vadd.s32 %v712_v61, %v709_v25  ;;  %vm790_vm3 = vcmask 253952  }
 0x2af   : > { %v508_v51 = vadd.s32 %v507_v37, %v505_v49  ;;  %v522_v52 = vadd.s32 %v521_v38, %v519_v50 }
 0x2b0   : > { %v532_v48 = vpop.xlane.xlu1 %531  ;;  %v546_v55 = vpop.xlane.xlu0 %545  ;;  %vm727_vm2 = vcmp.lt.s32.totalorder %v719_v35, 128 }
 0x2b1   : > { %v533_v56 = vcvt.f32.s32 %v532_v48  ;;  %v547_v57 = vcvt.f32.s32 %v546_v55  ;;  %vm568_vm5 = vcmp.eq.s32.totalorder %v1328_v40, %v508_v51  ;;  %vm569_vm6 = vcmp.eq.s32.totalorder %v1328_v40, %v522_v52 }
 0x2b2   : > { %1023 = vmatmul.mubr.msk.f32.vlgmr.msra.gmra.mrb[0].mxu1 %vm568_vm5, %v1191_v34 }
 0x2b3   : > { %v536_v58 = vadd.s32 %v535_v42, %v533_v56  ;;  %v550_v53 = vadd.s32 %v549_v47, %v547_v57  ;;  %1025 = vmatprep.mubr.msk.f32.mxu1 %vm569_vm6, %v1191_v34 }
 0x2b4   : > { %v560_v59 = vpop.xlane.xlu1 %559 }
 0x2b5   : > { %v561_v60 = vcvt.f32.s32 %v560_v59  ;;  %vm570_vm7 = vcmp.eq.s32.totalorder %v1328_v40, %v536_v58  ;;  %vm571_vm8 = vcmp.eq.s32.totalorder %v1328_v40, %v550_v53 }
 0x2b6   : > { %1026 = vmatmul.mubr.msk.f32.gmra.mrb[2].mxu1 %vm570_vm7, %v1191_v34 }
 0x2b7   : > { %v564_v1 = vadd.s32 %v563_v54, %v561_v60  ;;  %1028 = vmatprep.mubr.msk.f32.mxu1 %vm571_vm8, %v1191_v34 }
 0x2b9   : > { %vm572_vm9 = vcmp.eq.s32.totalorder %v1328_v40, %v564_v1  ;;  %v708_v40 = vadd.s32 40, %v703_v63 }
 0x2ba   : > { %1029 = vmatmul.mubr.msk.f32.gmra.mrb[4].mxu1 %vm572_vm9, %v1191_v34 }
 0x2bb   : > { %v718_v19 = vadd.s32 %v712_v61, %v708_v40 }
 0x2bd   : > { %vm726_vm14 = vcmp.lt.s32.totalorder %v718_v19, 128 }
 0x381   : > { %v1021_v4 = vpop.f32.mrb[8].mxu0 }
 0x382   : > { %695 = vst.msk [vmem:[%s1481_s12 + $0x8] sm:$0xff] %vm275_vm0, %v1021_v4  ;;  %v730_v39 = vsub.f32 %v1021_v4, %v1294_v7  ;;  %v655_v5 = vpop.f32.mrb[9].mxu0 }
 0x383   : > { %694 = vst.msk [vmem:[%s1481_s12] sm:$0xff] %vm275_vm0, %v655_v5  ;;  %v729_v18 = vsub.f32 %v655_v5, %v1292_v6 }
 0x384   : > { %v754_v11 = vsel %vm722_vm10, %v730_v39, 0.0 }
 0x385   : > { %v762_v21 = vmul.f32 %v754_v11, %v754_v11  ;;  %v753_v22 = vsel %vm721_vm11, %v729_v18, 0.0  ;;  %v1024_v23 = vpop.f32.mrb[0].mxu1 }
 0x386   : > { %v761_v26 = vmul.f32 %v753_v22, %v753_v22  ;;  %697 = vst.msk [vmem:[%s1481_s12 + $0x18] sm:$0xff] %vm275_vm0, %v1024_v23  ;;  %v732_v7 = vsub.f32 %v1024_v23, %v1301_v12  ;;  %v665_v27 = vpop.f32.mrb[1].mxu1  ;;  %v720_v12 = vadd.s32 %v712_v61, %v710_v24 }
 0x387   : > { %v770_v6 = vsel %vm275_vm0, %v762_v21, 0.0  ;;  %696 = vst.msk [vmem:[%s1481_s12 + $0x10] sm:$0xff] %vm275_vm0, %v665_v27  ;;  %v731_v29 = vsub.f32 %v665_v27, %v1296_v8 }
 0x388   : > { %v769_v30 = vsel %vm275_vm0, %v761_v26, 0.0  ;;  %v756_v31 = vsel %vm724_vm12, %v732_v7, 0.0  ;;  %vm728_vm1 = vcmp.lt.s32.totalorder %v720_v12, 128 }
 0x389   : > { %v771_v32 = vadd.f32 %v770_v6, %v769_v30  ;;  %v755_v33 = vsel %vm723_vm13, %v731_v29, 0.0  ;;  %v1027_v34 = vpop.f32.mrb[2].mxu1  ;;  %v764_v36 = vmul.f32 %v756_v31, %v756_v31 }
 0x38a   : > { %v763_v37 = vmul.f32 %v755_v33, %v755_v33  ;;  %699 = vst.msk [vmem:[%s1481_s12 + $0x28] sm:$0xff] %vm275_vm0, %v1027_v34  ;;  %v734_v38 = vsub.f32 %v1027_v34, %v1310_v16  ;;  %v675_v41 = vpop.f32.mrb[3].mxu1 }
 0x38b   : > { %698 = vst.msk [vmem:[%s1481_s12 + $0x20] sm:$0xff] %vm275_vm0, %v675_v41  ;;  %v733_v8 = vsub.f32 %v675_v41, %v1303_v13  ;;  %v774_v51 = vsel %vm275_vm0, %v764_v36, 0.0 }
 0x38c   : > { %v772_v43 = vsel %vm275_vm0, %v763_v37, 0.0  ;;  %v758_v44 = vsel %vm726_vm14, %v734_v38, 0.0 }
 0x38d   : > { %v773_v45 = vadd.f32 %v772_v43, %v771_v32  ;;  %v757_v49 = vsel %vm725_vm15, %v733_v8, 0.0  ;;  %v1030_v50 = vpop.f32.mrb[4].mxu1  ;;  %v766_v52 = vmul.f32 %v758_v44, %v758_v44 }
 0x38e   : > { %v765_v42 = vmul.f32 %v757_v49, %v757_v49  ;;  %701 = vst.msk [vmem:[%s1481_s12 + $0x38] sm:$0xff] %vm275_vm0, %v1030_v50  ;;  %v736_v16 = vsub.f32 %v1030_v50, %v1318_v20  ;;  %v685_v47 = vpop.f32.mrb[5].mxu1 }
 0x38f   : > { %v775_v46 = vadd.f32 %v774_v51, %v773_v45  ;;  %700 = vst.msk [vmem:[%s1481_s12 + $0x30] sm:$0xff] %vm275_vm0, %v685_v47  ;;  %v735_v13 = vsub.f32 %v685_v47, %v1312_v17  ;;  %v778_v58 = vsel %vm275_vm0, %v766_v52, 0.0 }
 0x390   : > { %v776_v48 = vsel %vm275_vm0, %v765_v42, 0.0  ;;  %v760_v55 = vsel %vm728_vm1, %v736_v16, 0.0 }
 0x391   : > { %v777_v56 = vadd.f32 %v776_v48, %v775_v46  ;;  %v759_v57 = vsel %vm727_vm2, %v735_v13, 0.0  ;;  %v768_v53 = vmul.f32 %v760_v55, %v760_v55 }
 0x392   : > { %v767_v59 = vmul.f32 %v759_v57, %v759_v57 }
 0x393   : > { %v779_v54 = vadd.f32 %v778_v58, %v777_v56  ;;  %v782_v1 = vsel %vm275_vm0, %v768_v53, 0.0 }
 0x394   : > { %v780_v20 = vsel %vm275_vm0, %v767_v59, 0.0 }
 0x395   : > { %v781_v60 = vadd.f32 %v780_v20, %v779_v54 }
 0x397   : > { %v783_v63 = vadd.f32 %v782_v1, %v781_v60 }
 0x399   : > { %v784_v0 = vrot.slane %v783_v63, 4 }
 0x39b   : > { %v785_v17 = vadd.f32 %v784_v0, %v783_v63 }
 0x39d   : > { %v786_v61 = vrot.slane %v785_v17, 2 }
 0x39f   : > { %v787_v62 = vadd.f32 %v786_v61, %v785_v17 }
 0x3a1   : > { %v788_v2 = vrot.slane %v787_v62, 1 }
 0x3a3   : > { %v789_v3 = vadd.f32 %v788_v2, %v787_v62 }
 0x3a5   : > { %791 = vst.msk [vmem:[%s225_s13] sm:$0x1] %vm790_vm3, %v789_v3 }
 0x3a6   : > { %1140 = shalt.err (!%p1137_p3)
}
 0x3a7   : > { %s1141_s7 = scalar_lea.hbm %s1521_s23, 16  ;;  %s1145_s10 = scalar_lea.hbm %s1568_s5, 32 }
 0x3a8   : > { %p1142_p4 = scmp.ne.s32.totalorder %s1521_s23, %s1141_s7  ;;  %p1146_p9 = scmp.lt.u32.totalorder %s1521_s23, %s1568_s5 }
 0x3a9   : > { %p1147_p10 = scmp.lt.u32.totalorder %s1145_s10, %s1141_s7  ;;  %p1149_p12 = scmp.lt.u32.totalorder %s1141_s7, %s1521_s23 }
 0x3aa   : > { %p1143_p7 = pnand %p1142_p4, %p1261_p5 }
 0x3ab   : > { %p1148_p11 = por %p1147_p10, %p1146_p9 }
 0x3ac   : > { %p1144_p8 = pneg %p1143_p7 }
 0x3ad   : > { %p1150_p13 = por %p1149_p12, %p1148_p11 }
 0x3af   : > { %p1151_p0 = pnand %p1150_p13, %p1144_p8 }
 0x3b1   : > { %1154 = shalt.err (!%p1151_p0)
}
 0x3b2   : > { %1087 = dma.vmem_to_hbm [thread:$0]  (%p1261_p5), %s1523_s15, 16, %s1521_s23, %s798_s25  }
 0x3b3 PF: > { %p1093_p1 = scmp.ge.s32.totalorder %s1189_s21, 2  ;;  %s834_s14 = sand.u32 1, %s1177_s18  }
 0x3b4   : > { %s835_s13 = scalar_lea.sflag [#allocation3], %s834_s14 }
 0x3b5   : > { %p1090_p2 = pnand %p1093_p1, %p1265_p6 }
 0x3b7   : > { %1172 = dma.done.wait (!%p1090_p2), %s835_s13, 16  }
 0x3b8   : > { %1174 = vsyncadd (!%p1090_p2), %s835_s13, 4294967280  ;;  %p16_p3 = scmp.ge.s32.totalorder %s1248_s24, 4   ;;  %s1571_s18 = smov %s1181_s19 }
 0x3b9   : > { %s1572_s19 = smov %s1185_s20  ;;  %s1573_s20 = smov %s1259_s27 }
 0x3ba   : > { %s1574_s21 = smov %s1248_s24  ;;  %18 = sbr.rel (!%p16_p3) target bundleno = 3 (0x3), region = 83 }
 0x3c1   :  { %839 = vsyncpa [#allocation3], 1 }
 0x3c2   :  { %841 = vsyncpa [#allocation3 + $0x1], 1 }

</bundles_post_ra>
